<compile_context>
chip_gen: v7x
topology: tpu7x:2x2x1
jax: 0.10.0
libtpu: 0.0.40
codegen_flags: <defaults>
</compile_context>

<pallas_src>
import jax
import jax.numpy as jnp
from jax.experimental import pallas as pl
from jax.experimental.pallas import tpu as pltpu


def basic_conv_kernel(x_ref, w_ref, sh_ref, o_ref):
    # x_ref : (1, H+2, W+2, Cin)  zero-padded image for this batch element (bf16)
    # w_ref : (9*Cin, TC)         im2col weights with BN scale folded in (bf16)
    # sh_ref: (1, TC)             folded conv-bias + BN shift (f32)
    # o_ref : (1, TH*W, TC)       lane-dense output tile (bf16)
    _, HWt, TC = o_ref.shape
    Cin = x_ref.shape[3]
    Wd = x_ref.shape[2] - 2            # output width W
    TH = HWt // Wd                     # rows in this output band

    r = pl.program_id(2)               # row-band axis (innermost)
    row0 = pl.multiple_of(r * TH, TH)

    # One dynamic row-band load; taps are static slices of the loaded value.
    band = x_ref[0, pl.ds(row0, TH + 2), :, :]                  # (TH+2, W+2, Cin)

    # im2col with minimal lane relayout: 3 minor-axis concats over dx, then the
    # 3 dy taps are free leading-axis slices, and one final 3-way concat.
    hpat = jnp.concatenate([band[:, dx:dx + Wd, :] for dx in range(3)],
                           axis=-1)                             # (TH+2, W, 3*Cin)
    patches = jnp.concatenate([hpat[dy:dy + TH] for dy in range(3)],
                              axis=-1)                          # (TH, W, 9*Cin)
    patches = patches.reshape(TH * Wd, 9 * Cin)                 # (TH*W, 9*Cin)

    # Single MXU matmul, f32 accumulate. BN scale already lives in the weights.
    acc = jnp.dot(patches, w_ref[...],
                  preferred_element_type=jnp.float32)           # (TH*W, TC)

    y = jnp.maximum(acc + sh_ref[0:1, :], 0.0)                  # shift + ReLU (f32)
    o_ref[0, :, :] = y.astype(o_ref.dtype)


def basic_conv(x_nchw, w_oihw, conv_bias, gamma, beta, running_mean, running_var,
               eps=1e-5, out_dtype=jnp.bfloat16):
    """Forward of basicConv (stride=1 path), matching PyTorch eval-mode semantics."""
    N, Cin, H, W = x_nchw.shape
    Cout = w_oihw.shape[0]

    # ---- Cout tiling: only pad to 128 lanes when Cout is already >= 128.
    if Cout >= 128:
        Cout_pad = ((Cout + 127) // 128) * 128
        TC = 256 if Cout_pad % 256 == 0 else 128   # fill 256-wide MXU N on v6e/v7x
    else:
        Cout_pad = Cout                            # full-dim block (masked stores)
        TC = Cout
    nC = Cout_pad // TC

    # ---- Row-band tiling: aim for TH*W >= 512 (MXU M) while TH divides H and the
    # band stays sublane-aligned (or is the full image).
    target_rows = max(1, min(H, -(-512 // W)))
    TH = H
    for d in range(target_rows, H + 1):
        if H % d == 0 and ((d * W) % 8 == 0 or d == H):
            TH = d
            break
    nH = H // TH

    # ---- NCHW -> NHWC, bf16, zero halo (3x3 conv, padding=1).
    x = jnp.transpose(x_nchw, (0, 2, 3, 1)).astype(jnp.bfloat16)     # (N, H, W, Cin)
    x_pad = jnp.pad(x, ((0, 0), (1, 1), (1, 1), (0, 0)))             # (N, H+2, W+2, Cin)

    # ---- Fold BN (inference) + conv bias:  y = relu(conv(x, W*scale) + shift).
    inv_std = 1.0 / jnp.sqrt(running_var.astype(jnp.float32) + eps)
    scale = gamma.astype(jnp.float32) * inv_std                                   # (Cout,)
    shift = beta.astype(jnp.float32) + (conv_bias.astype(jnp.float32)
                                        - running_mean.astype(jnp.float32)) * scale

    # OIHW -> (dy, dx, Cin, Cout) -> (9*Cin, Cout); scale folded in f32, then bf16.
    w_hwio = jnp.transpose(w_oihw, (2, 3, 1, 0)).reshape(9 * Cin, Cout)
    w_scaled = w_hwio.astype(jnp.float32) * scale[None, :]
    w_mat = jnp.zeros((9 * Cin, Cout_pad), jnp.bfloat16)
    w_mat = w_mat.at[:, :Cout].set(w_scaled.astype(jnp.bfloat16))

    sh = jnp.zeros((1, Cout_pad), jnp.float32).at[0, :Cout].set(shift)

    # ---- VMEM budget (double-buffered blocks + im2col / accumulator temporaries).
    out_isize = jnp.dtype(out_dtype).itemsize
    x_blk = (H + 2) * (W + 2) * Cin * 2
    w_blk = 9 * Cin * TC * 2
    sh_blk = TC * 4
    o_blk = TH * W * TC * out_isize
    vmem_est = (2 * (x_blk + w_blk + sh_blk + o_blk)
                + 3 * (TH + 2) * W * 3 * Cin * 2      # hpat + dy slices
                + TH * W * 9 * Cin * 2                # patches matrix
                + TH * W * TC * 4)                    # f32 accumulator / epilogue
    cp_kwargs = dict(dimension_semantics=("parallel", "parallel", "parallel"))
    if vmem_est > (28 << 20):
        cp_kwargs["vmem_limit_bytes"] = int(min(vmem_est + (8 << 20), 64 << 20))
    compiler_params = pltpu.CompilerParams(**cp_kwargs)

    flops = 2 * N * H * W * (9 * Cin) * Cout_pad
    bytes_accessed = (x_pad.size * 2 + N * (w_mat.size * 2 + sh.size * 4)
                      + N * H * W * Cout_pad * out_isize)

    out_flat = pl.pallas_call(
        basic_conv_kernel,
        out_shape=jax.ShapeDtypeStruct((N, H * W, Cout_pad), out_dtype),
        grid_spec=pltpu.PrefetchScalarGridSpec(
            num_scalar_prefetch=0,
            # row-band axis innermost: weight/shift tiles stay resident across it,
            # consecutive steps write contiguous bands of the same output slab.
            grid=(N, nC, nH),
            in_specs=[
                # Padded image; index_map depends only on b -> DMA'd once per image.
                pl.BlockSpec((1, H + 2, W + 2, Cin), lambda b, c, r: (b, 0, 0, 0)),
                pl.BlockSpec((9 * Cin, TC), lambda b, c, r: (0, c)),
                pl.BlockSpec((1, TC), lambda b, c, r: (0, c)),
            ],
            out_specs=pl.BlockSpec((1, TH * W, TC), lambda b, c, r: (b, r, c)),
        ),
        compiler_params=compiler_params,
        cost_estimate=pl.CostEstimate(flops=flops, transcendentals=0,
                                      bytes_accessed=bytes_accessed),
    )(x_pad, w_mat, sh)

    # Strip Cout padding (no-op when Cout < 128), back to PyTorch NCHW convention.
    # TODO(synk): fuse this strip/transpose into the consumer for full layer stacks.
    out = out_flat[:, :, :Cout].reshape(N, H, W, Cout)
    return jnp.transpose(out, (0, 3, 1, 2))


def _reference(x_nchw, w_oihw, conv_bias, gamma, beta, running_mean, running_var,
               eps=1e-5):
    """Pure-JAX f32 reference (lax conv) for a correctness sanity check."""
    z = jax.lax.conv_general_dilated(
        x_nchw, w_oihw, window_strides=(1, 1), padding=((1, 1), (1, 1)),
        dimension_numbers=("NCHW", "OIHW", "NCHW"))
    z = z + conv_bias[None, :, None, None]
    inv_std = 1.0 / jnp.sqrt(running_var + eps)
    z = (z - running_mean[None, :, None, None]) * (gamma * inv_std)[None, :, None, None] \
        + beta[None, :, None, None]
    return jnp.maximum(z, 0.0)


if __name__ == "__main__":
    # Small shapes consistent with basicConv (scaled-down channels).
    N, Cin, Cout, H, W = 2, 16, 32, 16, 16

    key = jax.random.PRNGKey(0)
    kx, kw, kb, kg, kbt, km, kv = jax.random.split(key, 7)

    x = jax.random.normal(kx, (N, Cin, H, W), dtype=jnp.float32)
    w = jax.random.normal(kw, (Cout, Cin, 3, 3), dtype=jnp.float32) * 0.1
    conv_bias = jax.random.normal(kb, (Cout,), dtype=jnp.float32) * 0.1
    gamma = 1.0 + 0.1 * jax.random.normal(kg, (Cout,), dtype=jnp.float32)
    beta = 0.1 * jax.random.normal(kbt, (Cout,), dtype=jnp.float32)
    running_mean = 0.1 * jax.random.normal(km, (Cout,), dtype=jnp.float32)
    running_var = jnp.abs(1.0 + 0.1 * jax.random.normal(kv, (Cout,), dtype=jnp.float32))

    out = basic_conv(x, w, conv_bias, gamma, beta, running_mean, running_var)
    out = jax.block_until_ready(out)

    ref = _reference(x, w, conv_bias, gamma, beta, running_mean, running_var)
    assert out.shape == (N, Cout, H, W)
    # bf16 matmul inputs, bf16 output, f32 accumulation -> loose tolerance vs f32 ref.
    assert jnp.allclose(out.astype(jnp.float32), ref, atol=1e-1, rtol=1e-1), \
        "mismatch vs reference"

    print("KERNEL_OK")
</pallas_src>

<mosaic_0001>
module attributes {stable_mosaic.version = 11 : i64} {
  func.func @basic_conv_kernel(%arg0: i32, %arg1: i32, %arg2: i32, %arg3: memref<1x18x18x16xbf16, #tpu.memory_space<vmem>>, %arg4: memref<144x32xbf16, #tpu.memory_space<vmem>>, %arg5: memref<1x32xf32, #tpu.memory_space<vmem>>, %arg6: memref<1x256x32xbf16, #tpu.memory_space<vmem>>) attributes {dimension_semantics = [#tpu.dimension_semantics<parallel>, #tpu.dimension_semantics<parallel>, #tpu.dimension_semantics<parallel>], iteration_bounds = array<i64: 2, 1, 1>, scalar_prefetch = 0 : i64, scratch_operands = 0 : i64, tpu.core_type = #tpu.core_type<tc>, window_params = [{transform_indices = @transform_0, window_bounds = array<i64: 1, 18, 18, 16>}, {transform_indices = @transform_1, window_bounds = array<i64: 144, 32>}, {transform_indices = @transform_2, window_bounds = array<i64: 1, 32>}, {transform_indices = @transform_3, window_bounds = array<i64: 1, 256, 32>}]} {
    %c16_i32 = arith.constant 16 : i32
    %0 = arith.muli %arg2, %c16_i32 : i32
    %1 = tpu.assume_multiple %0, 16 : i32
    %c0 = arith.constant 0 : index
    %2 = arith.index_cast %1 : i32 to index
    %c0_0 = arith.constant 0 : index
    %c0_1 = arith.constant 0 : index
    %3 = vector.load %arg3[%c0, %2, %c0_0, %c0_1] : memref<1x18x18x16xbf16, #tpu.memory_space<vmem>>, vector<1x18x18x16xbf16>
    %4 = vector.shape_cast %3 : vector<1x18x18x16xbf16> to vector<18x18x16xbf16>
    %5 = vector.extract_strided_slice %4 {offsets = [0, 0, 0], sizes = [18, 16, 16], strides = [1, 1, 1]} : vector<18x18x16xbf16> to vector<18x16x16xbf16>
    %6 = vector.extract_strided_slice %4 {offsets = [0, 1, 0], sizes = [18, 16, 16], strides = [1, 1, 1]} : vector<18x18x16xbf16> to vector<18x16x16xbf16>
    %7 = vector.extract_strided_slice %4 {offsets = [0, 2, 0], sizes = [18, 16, 16], strides = [1, 1, 1]} : vector<18x18x16xbf16> to vector<18x16x16xbf16>
    %8 = tpu.concatenate %5, %6, %7 in 2 : vector<18x16x16xbf16>, vector<18x16x16xbf16>, vector<18x16x16xbf16> -> vector<18x16x48xbf16>
    %9 = vector.extract_strided_slice %8 {offsets = [0, 0, 0], sizes = [16, 16, 48], strides = [1, 1, 1]} : vector<18x16x48xbf16> to vector<16x16x48xbf16>
    %10 = vector.extract_strided_slice %8 {offsets = [1, 0, 0], sizes = [16, 16, 48], strides = [1, 1, 1]} : vector<18x16x48xbf16> to vector<16x16x48xbf16>
    %11 = vector.extract_strided_slice %8 {offsets = [2, 0, 0], sizes = [16, 16, 48], strides = [1, 1, 1]} : vector<18x16x48xbf16> to vector<16x16x48xbf16>
    %12 = tpu.concatenate %9, %10, %11 in 2 : vector<16x16x48xbf16>, vector<16x16x48xbf16>, vector<16x16x48xbf16> -> vector<16x16x144xbf16>
    %13 = vector.shape_cast %12 : vector<16x16x144xbf16> to vector<256x144xbf16>
    %c0_2 = arith.constant 0 : index
    %c0_3 = arith.constant 0 : index
    %14 = vector.load %arg4[%c0_2, %c0_3] : memref<144x32xbf16, #tpu.memory_space<vmem>>, vector<144x32xbf16>
    %cst = arith.constant dense<0.000000e+00> : vector<256x32xf32>
    %15 = tpu.matmul %13, %14, %cst {dimension_numbers = #tpu.dot_dimension_numbers<[1], [0], [0], [1], [0, 0, 1, 1], [], []>} : vector<256x144xbf16>, vector<144x32xbf16>, vector<256x32xf32> -> vector<256x32xf32>
    %c0_4 = arith.constant 0 : index
    %c0_5 = arith.constant 0 : index
    %16 = vector.load %arg5[%c0_4, %c0_5] : memref<1x32xf32, #tpu.memory_space<vmem>>, vector<1x32xf32>
    %17 = vector.broadcast %16 : vector<1x32xf32> to vector<256x32xf32>
    %18 = arith.addf %15, %17 : vector<256x32xf32>
    %cst_6 = arith.constant 0.000000e+00 : f32
    %19 = vector.broadcast %cst_6 : f32 to vector<256x32xf32>
    %20 = arith.maximumf %18, %19 : vector<256x32xf32>
    %21 = arith.truncf %20 : vector<256x32xf32> to vector<256x32xbf16>
    %c0_7 = arith.constant 0 : index
    %c0_8 = arith.constant 0 : index
    %c0_9 = arith.constant 0 : index
    %22 = vector.load %arg6[%c0_7, %c0_8, %c0_9] : memref<1x256x32xbf16, #tpu.memory_space<vmem>>, vector<1x256x32xbf16>
    %23 = vector.shape_cast %22 : vector<1x256x32xbf16> to vector<256x32xbf16>
    %24 = vector.shape_cast %21 : vector<256x32xbf16> to vector<1x256x32xbf16>
    tpu.vector_store %arg6[%c0_7, %c0_8, %c0_9], %24 {strides = array<i32>} : memref<1x256x32xbf16, #tpu.memory_space<vmem>>, vector<1x256x32xbf16>,
    return
  }
  func.func @transform_0(%arg0: i32, %arg1: i32, %arg2: i32) -> (i32, i32, i32, i32) {
    %c0_i32 = arith.constant 0 : i32
    %c0_i32_0 = arith.constant 0 : i32
    %c0_i32_1 = arith.constant 0 : i32
    %c0_i32_2 = arith.constant 0 : i32
    return %arg0, %c0_i32, %c0_i32_0, %c0_i32_1 : i32, i32, i32, i32
  }
  func.func @transform_1(%arg0: i32, %arg1: i32, %arg2: i32) -> (i32, i32) {
    %c0_i32 = arith.constant 0 : i32
    %c0_i32_0 = arith.constant 0 : i32
    return %c0_i32, %arg1 : i32, i32
  }
  func.func @transform_2(%arg0: i32, %arg1: i32, %arg2: i32) -> (i32, i32) {
    %c0_i32 = arith.constant 0 : i32
    %c0_i32_0 = arith.constant 0 : i32
    return %c0_i32, %arg1 : i32, i32
  }
  func.func @transform_3(%arg0: i32, %arg1: i32, %arg2: i32) -> (i32, i32, i32) {
    %c0_i32 = arith.constant 0 : i32
    return %arg0, %arg2, %arg1 : i32, i32, i32
  }
}

</mosaic_0001>

<bundles_post_ra>
// kernel: tpu_custom_call.1
= control target key start
LH: loop header
LB: loop body
LE: loop exit
PB: predicated region body
PF: predicated region fallthrough
CT: control target
= control target key end

     0   :  { %s1893_s12 = smov 0   ;;  %s1895_s13 = smov 0   ;;  %s2471_s0 = inlined_call_operand.vmem [shape: bf16[2,18,18,16], index: 0, kind: input, shape index: {}]   ;;  %s2472_s1 = inlined_call_operand.vmem [shape: bf16[144,32], index: 1, kind: input, shape index: {}]   ;;  %s2473_s2 = inlined_call_operand.vmem [shape: f32[1,32], index: 2, kind: input, shape index: {}]   ;;  %s2474_s3 = inlined_call_operand.vmem [shape: bf16[2,256,32], index: 3, kind: output, shape index: {}]  }
   0x1   :  { %s1897_s14 = smov 0  }
   0x2 LB: > { %s32_s15 = sadd.s32 1, %s1862_s13  ;;  %p1618_p0 = scmp.ge.s32.totalorder %s1866_s14, 1  ;;  %s1866_s14 = sphi %s1897_s14, %s13_s14   ;;  %s1862_s13 = sphi %s1895_s13, %s2476_s13   ;;  %s1858_s12 = sphi %s1893_s12, %s2475_s12  }
   0x3   : > { %p34_p1 = scmp.ge.s32.totalorder %s32_s15, 2  ;;  %p177_p2 = scmp.lt.s32.totalorder %s1866_s14, 3 }
   0x5   : > { %s2478_s15 = smov (%p34_p1, %s32_s15), 0  ;;  %p178_p3 = pnand %p1618_p0, %p177_p2 }
   0x6   : > { %p215_p4 = scmp.lt.s32.totalorder (!%p178_p3), %s1858_s12, 1  ;;  %vm696_vm0 = vcmask (!%p178_p3), 1046528   ;;  %vm443_vm1 = vsmask.f32 (!%p178_p3), 7424  ;;  %s1868_s20 = smov (!%p178_p3), 32   ;;  %vm787_vm2 = vcmask (!%p178_p3), 130048  }
   0x7   : > { %181 = sbr.rel (%p178_p3) target bundleno = 549 (0x225), region = 32  ;;  %s1869_s21 = smov (!%p178_p3), 16   ;;  %vm824_vm3 = vcmask (!%p178_p3), 261120   ;;  %vm942_vm4 = vcmask (!%p178_p3), 392192   ;;  %vm975_vm5 = vcmask (!%p178_p3), 785408   ;;  %vm1456_vm6 = vcmask (!%p178_p3), 257024  }
   0x8   : > { %s1871_s17 = smov (!%p178_p3), 48   ;;  %s1872_s18 = smov (!%p178_p3), 96  }
   0xe   : > { %s2480_s12 = smov (!%p215_p4, %s1858_s12), 1 }
   0xf   : > { %s1769_s16 = smul.u32 216, %s2480_s12 }
  0x11   : > { %s1917_s19 = scalar_lea.vmem %s2471_s0, %s1769_s16 }
  0x12   : > { %v1920_v0 = vld [vmem:[%s1917_s19 + $0x6c] sm:$0xff]   ;;  %v1800_v1 = vld [vmem:[%s1917_s19 + $0x74] ss:$0 sps:$4 sm:$0x11]   ;;  %v1929_v6 = vld [vmem:[%s1917_s19 + $0x78] sm:$0xff]  }
  0x13   : > { %v1924_v2 = vld [vmem:[%s1917_s19 + $0xc] sm:$0xff]   ;;  %v724_v3 = vrot.slane %v1920_v0, 1  ;;  %v725_v4 = vrot.slane %v1800_v1, 1  ;;  %v1802_v5 = vld [vmem:[%s1917_s19 + $0x14] ss:$0 sps:$4 sm:$0x11]  }
  0x14   : > { %v700_v7 = vrot.slane %v1924_v2, 1  ;;  %v1933_v8 = vld [vmem:[%s1917_s19 + $0x18] sm:$0xff]   ;;  %v701_v10 = vrot.slane %v1802_v5, 1  ;;  %v1804_v11 = vld [vmem:[%s1917_s19 + $0x80] ss:$0 sps:$4 sm:$0x11]  }
  0x15   : > { %v726_v9 = vsel %vm696_vm0, %v724_v3, %v725_v4  ;;  %v727_v12 = vrot.slane %v1929_v6, 1  ;;  %v703_v13 = vrot.slane %v1933_v8, 1  ;;  %v728_v15 = vrot.slane %v1804_v11, 1  ;;  %v1806_v16 = vld [vmem:[%s1917_s19 + $0x20] ss:$0 sps:$4 sm:$0x11]  }
  0x16   : > { %769 = vrot.lane.b32.xlu1 %v726_v9, %s1868_s20  ;;  %v702_v14 = vsel %vm696_vm0, %v700_v7, %v701_v10  ;;  %v469_v17 = vshrl.u32 %v1933_v8, 16  ;;  %v471_v18 = vshll.u32 %v1933_v8, 16  ;;  %v457_v19 = vshrl.u32 %v1924_v2, 16  ;;  %v1949_v25 = vld [vmem:[%s1917_s19 + $0x24] sm:$0xff]   ;;  %v1974_v57 = vld [vmem:[%s1917_s19 + $0x30] sm:$0xff]  }
  0x17   : > { %753 = vrot.lane.b32.xlu0 %v702_v14, %s1868_s20  ;;  %v459_v20 = vshll.u32 %v1924_v2, 16  ;;  %v729_v21 = vsel %vm696_vm0, %v727_v12, %v728_v15  ;;  %v704_v22 = vrot.slane %v1806_v16, 1  ;;  %v476_v23 = vshll.u32 %v1806_v16, 16  ;;  %v1808_v34 = vld [vmem:[%s1917_s19 + $0x2c] ss:$0 sps:$4 sm:$0x11]  }
  0x18   : > { %v464_v24 = vshll.u32 %v1802_v5, 16  ;;  %v473_v26 = vrot.slane %v471_v18, 1  ;;  %v565_v28 = vshrl.u32 %v1929_v6, 16  ;;  %v567_v29 = vshll.u32 %v1929_v6, 16  ;;  %v1964_v47 = vld [vmem:[%s1917_s19 + $0x84] sm:$0xff]   ;;  %v1977_v62 = vld [vmem:[%s1917_s19 + $0x90] sm:$0xff]  }
  0x19   : > { %v461_v27 = vrot.slane %v459_v20, 1  ;;  %v705_v30 = vsel %vm696_vm0, %v703_v13, %v704_v22  ;;  %v478_v31 = vrot.slane %v476_v23, 1  ;;  %v572_v33 = vshll.u32 %v1804_v11, 16  ;;  %v1810_v48 = vld [vmem:[%s1917_s19 + $0x8c] ss:$0 sps:$4 sm:$0x11]  }
  0x1a   : > { %771 = vrot.lane.b32.xlu1 %v729_v21, %s1868_s20  ;;  %v466_v32 = vrot.slane %v464_v24, 1  ;;  %v474_v35 = vor.u32 %v473_v26, %v469_v17  ;;  %v569_v37 = vrot.slane %v567_v29, 1  ;;  %v553_v38 = vshrl.u32 %v1920_v0, 16  ;;  %v1812_v5 = vld [vmem:[%s1917_s19 + $0x38] ss:$0 sps:$4 sm:$0x11]  }
  0x1b   : > { %755 = vrot.lane.b32.xlu0 %v705_v30, %s1868_s20  ;;  %v462_v36 = vor.u32 %v461_v27, %v457_v19  ;;  %v574_v39 = vrot.slane %v572_v33, 1  ;;  %v555_v40 = vshll.u32 %v1920_v0, 16  ;;  %v560_v41 = vshll.u32 %v1800_v1, 16  ;;  %v1814_v13 = vld [vmem:[%s1917_s19 + $0x98] ss:$0 sps:$4 sm:$0x11]  }
  0x1c   : > { %v481_v42 = vshrl.u32 %v1949_v25, 16  ;;  %v479_v43 = vsel %vm443_vm1, %v474_v35, %v478_v31  ;;  %v570_v45 = vor.u32 %v569_v37, %v565_v28  ;;  %v483_v46 = vshll.u32 %v1949_v25, 16  ;;  %v1991_v18 = vld [vmem:[%s1917_s19 + $0x3c] sm:$0xff]   ;;  %v1816_v28 = vld [vmem:[%s1917_s19 + $0x44] ss:$0 sps:$4 sm:$0x11]  }
  0x1d   : > { %v467_v44 = vsel %vm443_vm1, %v462_v36, %v466_v32  ;;  %v557_v49 = vrot.slane %v555_v40, 1  ;;  %v562_v50 = vrot.slane %v560_v41, 1  ;;  %v488_v51 = vshll.u32 %v1808_v34, 16  ;;  %v1996_v23 = vld [vmem:[%s1917_s19 + $0x9c] sm:$0xff]  }
  0x1e   : > { %664 = vrot.lane.b32.xlu1 %v479_v43, %s1869_s21  ;;  %v706_v52 = vrot.slane %v1949_v25, 1  ;;  %v575_v53 = vsel %vm443_vm1, %v570_v45, %v574_v39  ;;  %v485_v54 = vrot.slane %v483_v46, 1  ;;  %v577_v55 = vshrl.u32 %v1964_v47, 16  ;;  %v2012_v43 = vld [vmem:[%s1917_s19 + $0xa8] sm:$0xff]  }
  0x1f   : > { %662 = vrot.lane.b32.xlu0 %v467_v44, %s1869_s21  ;;  %v579_v56 = vshll.u32 %v1964_v47, 16  ;;  %v558_v58 = vor.u32 %v557_v49, %v553_v38  ;;  %v490_v59 = vrot.slane %v488_v51, 1  ;;  %v584_v60 = vshll.u32 %v1810_v48, 16  ;;  %v2017_v49 = vld [vmem:[%s1917_s19 + $0x48] sm:$0xff]  }
  0x20   : > { %v707_v61 = vrot.slane %v1808_v34, 1  ;;  %v486_v63 = vor.u32 %v485_v54, %v481_v42  ;;  %v730_v3 = vrot.slane %v1964_v47, 1  ;;  %v731_v4 = vrot.slane %v1810_v48, 1  ;;  %v1818_v34 = vld [vmem:[%s1917_s19 + $0xa4] ss:$0 sps:$4 sm:$0x11]  }
  0x21   : > { %v581_v1 = vrot.slane %v579_v56, 1  ;;  %v563_v7 = vsel %vm443_vm1, %v558_v58, %v562_v50  ;;  %v586_v9 = vrot.slane %v584_v60, 1  ;;  %v493_v10 = vshrl.u32 %v1974_v57, 16  ;;  %v2023_v54 = vld [vmem:[%s1917_s19 + $0xb0] ss:$0 sps:$4 sm:$0x11]  }
  0x22   : > { %680 = vrot.lane.b32.xlu1 %v575_v53, %s1869_s21  ;;  %v495_v12 = vshll.u32 %v1974_v57, 16  ;;  %v491_v14 = vsel %vm443_vm1, %v486_v63, %v490_v59  ;;  %v500_v15 = vshll.u32 %v1812_v5, 16  ;;  %v589_v16 = vshrl.u32 %v1977_v62, 16  ;;  %v1820_v59 = vld [vmem:[%s1917_s19 + $0x50] ss:$0 sps:$4 sm:$0x11]  }
  0x23   : > { %678 = vrot.lane.b32.xlu0 %v563_v7, %s1869_s21  ;;  %v582_v11 = vor.u32 %v581_v1, %v577_v55  ;;  %v591_v17 = vshll.u32 %v1977_v62, 16  ;;  %v596_v21 = vshll.u32 %v1814_v13, 16  ;;  %v708_v24 = vsel %vm696_vm0, %v706_v52, %v707_v61 }
  0x24   : > { %v497_v20 = vrot.slane %v495_v12, 1  ;;  %v732_v26 = vsel %vm696_vm0, %v730_v3, %v731_v4  ;;  %v502_v30 = vrot.slane %v500_v15, 1  ;;  %v507_v32 = vshll.u32 %v1991_v18, 16  ;;  %v2042_v15 = vld [vmem:[%s1917_s19 + $0x54] sm:$0xff]  }
  0x25   : > { %v587_v19 = vsel %vm443_vm1, %v582_v11, %v586_v9  ;;  %v593_v22 = vrot.slane %v591_v17, 1  ;;  %v598_v27 = vrot.slane %v596_v21, 1  ;;  %v709_v33 = vrot.slane %v1974_v57, 1  ;;  %v2046_v17 = vld [vmem:[%s1917_s19 + $0x5c] ss:$0 sps:$4 sm:$0x11]  }
  0x26   : > { %682 = vrot.lane.b32.xlu1 %v587_v19, %s1869_s21  ;;  %v498_v29 = vor.u32 %v497_v20, %v493_v10  ;;  %v710_v35 = vrot.slane %v1812_v5, 1  ;;  %v733_v36 = vrot.slane %v1977_v62, 1  ;;  %v734_v37 = vrot.slane %v1814_v13, 1  ;;  %v2037_v10 = vld [vmem:[%s1917_s19 + $0xb4] sm:$0xff]  }
  0x27   : > { %666 = vrot.lane.b32.xlu0 %v491_v14, %s1869_s21  ;;  %v594_v31 = vor.u32 %v593_v22, %v589_v16  ;;  %v603_v38 = vshll.u32 %v1996_v23, 16  ;;  %v512_v40 = vshll.u32 %v1816_v28, 16  ;;  %v601_v41 = vshrl.u32 %v1996_v23, 16  ;;  %v1826_v22 = vld [vmem:[%s1917_s19 + $0xbc] ss:$0 sps:$4 sm:$0x11]  }
  0x28   : > { %v608_v42 = vshll.u32 %v1818_v34, 16  ;;  %v503_v44 = vsel %vm443_vm1, %v498_v29, %v502_v30  ;;  %v505_v45 = vshrl.u32 %v1991_v18, 16  ;;  %v509_v46 = vrot.slane %v507_v32, 1 }
  0x29   : > { %v599_v39 = vsel %vm443_vm1, %v594_v31, %v598_v27  ;;  %v605_v48 = vrot.slane %v603_v38, 1  ;;  %v735_v50 = vsel %vm696_vm0, %v733_v36, %v734_v37  ;;  %v514_v51 = vrot.slane %v512_v40, 1  ;;  %v2067_v40 = vld [vmem:[%s1917_s19 + $0x60] sm:$0xff]  }
  0x2a   : > { %773 = vrot.lane.b32.xlu1 %v732_v26, %s1868_s20  ;;  %v610_v53 = vrot.slane %v608_v42, 1  ;;  %v615_v55 = vshll.u32 %v2012_v43, 16  ;;  %v711_v56 = vsel %vm696_vm0, %v709_v33, %v710_v35  ;;  %v510_v58 = vor.u32 %v509_v46, %v505_v45  ;;  %v2061_v35 = vld [vmem:[%s1917_s19 + $0xc0] sm:$0xff]   ;;  %v1830_v46 = vld [vmem:[%s1917_s19 + $0xc8] ss:$0 sps:$4 sm:$0x11]  }
  0x2b   : > { %757 = vrot.lane.b32.xlu0 %v708_v24, %s1868_s20  ;;  %v606_v52 = vor.u32 %v605_v48, %v601_v41  ;;  %v519_v60 = vshll.u32 %v2017_v49, 16  ;;  %v712_v61 = vrot.slane %v1991_v18, 1  ;;  %v713_v63 = vrot.slane %v1816_v28, 1 }
  0x2c   : > { %v736_v1 = vrot.slane %v1996_v23, 1  ;;  %v737_v3 = vrot.slane %v1818_v34, 1  ;;  %v613_v4 = vshrl.u32 %v2012_v43, 16  ;;  %v620_v5 = vshll.u32 %v2023_v54, 16 }
  0x2d   : > { %v611_v7 = vsel %vm443_vm1, %v606_v52, %v610_v53  ;;  %v617_v9 = vrot.slane %v615_v55, 1  ;;  %v515_v11 = vsel %vm443_vm1, %v510_v58, %v514_v51  ;;  %v517_v12 = vshrl.u32 %v2017_v49, 16  ;;  %v1832_v52 = vld [vmem:[%s1917_s19 + $0xd4] ss:$0 sps:$4 sm:$0x11]  }
  0x2e   : > { %684 = vrot.lane.b32.xlu1 %v599_v39, %s1869_s21  ;;  %v521_v13 = vrot.slane %v519_v60, 1  ;;  %v524_v14 = vshll.u32 %v1820_v59, 16  ;;  %v622_v16 = vrot.slane %v620_v5, 1  ;;  %v714_v19 = vsel %vm696_vm0, %v712_v61, %v713_v63  ;;  %v1834_v5 = vld [vmem:[%s1917_s19 + $0x8] ss:$0 sps:$4 sm:$0x11]  }
  0x2f   : > { %668 = vrot.lane.b32.xlu0 %v503_v44, %s1869_s21  ;;  %v738_v20 = vsel %vm696_vm0, %v736_v1, %v737_v3  ;;  %v618_v21 = vor.u32 %v617_v9, %v613_v4  ;;  %v627_v24 = vshll.u32 %v2037_v10, 16  ;;  %v715_v28 = vrot.slane %v2017_v49, 1  ;;  %v2071_v44 = vld [vmem:[%s1917_s19 + $0xcc] sm:$0xff]  }
  0x30   : > { %v522_v26 = vor.u32 %v521_v13, %v517_v12  ;;  %v526_v27 = vrot.slane %v524_v14, 1  ;;  %v531_v29 = vshll.u32 %v2042_v15, 16  ;;  %v716_v30 = vrot.slane %v1820_v59, 1  ;;  %v2085_v59 = vld [vmem:[%s1917_s19] sm:$0xff]  }
  0x31   : > { %v739_v31 = vrot.slane %v2012_v43, 1  ;;  %v740_v32 = vrot.slane %v2023_v54, 1  ;;  %v529_v33 = vshrl.u32 %v2042_v15, 16  ;;  %v536_v34 = vshll.u32 %v2046_v17, 16 }
  0x32   : > { %775 = vrot.lane.b32.xlu1 %v735_v50, %s1868_s20  ;;  %v623_v36 = vsel %vm443_vm1, %v618_v21, %v622_v16  ;;  %v625_v37 = vshrl.u32 %v2037_v10, 16  ;;  %v629_v38 = vrot.slane %v627_v24, 1  ;;  %v632_v39 = vshll.u32 %v1826_v22, 16  ;;  %v1828_v50 = vld [vmem:[%s1917_s19 + $0x68] ss:$0 sps:$4 sm:$0x11]  }
  0x33   : > { %759 = vrot.lane.b32.xlu0 %v711_v56, %s1868_s20  ;;  %v527_v41 = vsel %vm443_vm1, %v522_v26, %v526_v27  ;;  %v533_v42 = vrot.slane %v531_v29, 1  ;;  %v718_v45 = vrot.slane %v2042_v15, 1  ;;  %v719_v48 = vrot.slane %v2046_v17, 1 }
  0x34   : > { %v639_v51 = vshll.u32 %v2061_v35, 16  ;;  %v748_v53 = vrot.slane %v2071_v44, 1  ;;  %v717_v54 = vsel %vm696_vm0, %v715_v28, %v716_v30  ;;  %v741_v55 = vsel %vm696_vm0, %v739_v31, %v740_v32 }
  0x35   : > { %v630_v56 = vor.u32 %v629_v38, %v625_v37  ;;  %v634_v58 = vrot.slane %v632_v39, 1  ;;  %v534_v60 = vor.u32 %v533_v42, %v529_v33  ;;  %v538_v61 = vrot.slane %v536_v34, 1 }
  0x36   : > { %686 = vrot.lane.b32.xlu1 %v611_v7, %s1869_s21  ;;  %v543_v63 = vshll.u32 %v2067_v40, 16  ;;  %v749_v1 = vrot.slane %v1832_v52, 1  ;;  %v742_v3 = vrot.slane %v2037_v10, 1  ;;  %v743_v4 = vrot.slane %v1826_v22, 1 }
  0x37   : > { %670 = vrot.lane.b32.xlu0 %v515_v11, %s1869_s21  ;;  %v697_v7 = vrot.slane %v2085_v59, 1  ;;  %v637_v9 = vshrl.u32 %v2061_v35, 16  ;;  %v641_v11 = vrot.slane %v639_v51, 1  ;;  %v635_v13 = vsel %vm443_vm1, %v630_v56, %v634_v58 }
  0x38   : > { %v750_v12 = vsel %vm696_vm0, %v748_v53, %v749_v1  ;;  %v644_v14 = vshll.u32 %v1830_v46, 16  ;;  %v698_v16 = vrot.slane %v1834_v5, 1  ;;  %v539_v17 = vsel %vm443_vm1, %v534_v60, %v538_v61  ;;  %v1835_v61 = vld [vmem:[%s2472_s1] sm:$0xff]   ;;  %v1836_v1 = vld [vmem:[%s2472_s1 + $0x8] sm:$0xff]  }
  0x39   : > { %v548_v21 = vshll.u32 %v1828_v50, 16  ;;  %v744_v24 = vsel %vm696_vm0, %v742_v3, %v743_v4  ;;  %v642_v26 = vor.u32 %v641_v11, %v637_v9  ;;  %v447_v28 = vshll.u32 %v2085_v59, 16  ;;  %v1837_v3 = vld [vmem:[%s2472_s1 + $0x10] sm:$0xff]   ;;  %v1838_v4 = vld [vmem:[%s2472_s1 + $0x18] sm:$0xff]  }
  0x3a   : > { %777 = vrot.lane.b32.xlu1 %v738_v20, %s1868_s20  ;;  %v545_v20 = vrot.slane %v543_v63, 1  ;;  %v699_v22 = vsel %vm696_vm0, %v697_v7, %v698_v16  ;;  %v646_v27 = vrot.slane %v644_v14, 1  ;;  %v720_v29 = vsel %vm696_vm0, %v718_v45, %v719_v48  ;;  %v1840_v7 = vld [vmem:[%s2472_s1 + $0x28] sm:$0xff]   ;;  %v1841_v9 = vld [vmem:[%s2472_s1 + $0x30] sm:$0xff]   ;;  %v1842_v11 = vld [vmem:[%s2472_s1 + $0x38] sm:$0xff]  }
  0x3b   : > { %761 = vrot.lane.b32.xlu0 %v714_v19, %s1868_s20  ;;  %v541_v19 = vshrl.u32 %v2067_v40, 16  ;;  %v550_v31 = vrot.slane %v548_v21, 1  ;;  %v651_v32 = vshll.u32 %v2071_v44, 16  ;;  %v721_v33 = vrot.slane %v2067_v40, 1 }
  0x3c   : > { %v722_v34 = vrot.slane %v1828_v50, 1  ;;  %v746_v37 = vrot.slane %v1830_v46, 1  ;;  %v647_v38 = vsel %vm443_vm1, %v642_v26, %v646_v27  ;;  %v445_v39 = vshrl.u32 %v2085_v59, 16 }
  0x3d   : > { %v546_v30 = vor.u32 %v545_v20, %v541_v19  ;;  %v452_v42 = vshll.u32 %v1834_v5, 16  ;;  %v649_v48 = vshrl.u32 %v2071_v44, 16  ;;  %v653_v51 = vrot.slane %v651_v32, 1  ;;  %v1839_v5 = vld [vmem:[%s2472_s1 + $0x20] sm:$0xff]  }
  0x3e   : > { %688 = vrot.lane.b32.xlu1 %v623_v36, %s1869_s21  ;;  %v745_v36 = vrot.slane %v2061_v35, 1  ;;  %v656_v53 = vshll.u32 %v1832_v52, 16  ;;  %v1870_v63 = vmov 0  }
  0x3f   : > { %672 = vrot.lane.b32.xlu0 %v527_v41, %s1869_s21  ;;  %v449_v41 = vrot.slane %v447_v28, 1  ;;  %v551_v45 = vsel %vm443_vm1, %v546_v30, %v550_v31  ;;  %v654_v56 = vor.u32 %v653_v51, %v649_v48  ;;  %1135 = vmatprep.subr.bf16.mxu0 %v1870_v63 }
  0x40   : > { %v747_v46 = vsel %vm696_vm0, %v745_v36, %v746_v37  ;;  %v658_v58 = vrot.slane %v656_v53, 1  ;;  %1751 = vmatprep.subr.bf16.mxu1 %v1870_v63  ;;  %1136 = vmatpush1.bf16.msra.mxu0 %v1835_v61 }
  0x41   : > { %v450_v50 = vor.u32 %v449_v41, %v445_v39  ;;  %1137 = vmatprep.subr.bf16.mxu0 %v1870_v63  ;;  %1760 = vmatpush1.bf16.msra.mxu1 %v1835_v61 }
  0x42   : > { %779 = vrot.lane.b32.xlu1 %v741_v55, %s1868_s20  ;;  %v723_v55 = vsel %vm696_vm0, %v721_v33, %v722_v34  ;;  %v659_v52 = vsel %vm443_vm1, %v654_v56, %v658_v58  ;;  %1752 = vmatprep.subr.bf16.mxu1 %v1870_v63 }
  0x43   : > { %763 = vrot.lane.b32.xlu0 %v717_v54, %s1868_s20  ;;  %v454_v54 = vrot.slane %v452_v42, 1 }
  0x44   : > { %1138 = vmatpush1.bf16.msra.mxu0 %v1836_v1 }
  0x45   : > { %v455_v60 = vsel %vm443_vm1, %v450_v50, %v454_v54  ;;  %1139 = vmatprep.subr.bf16.mxu0 %v1870_v63  ;;  %1761 = vmatpush1.bf16.msra.mxu1 %v1836_v1 }
  0x46   : > { %690 = vrot.lane.b32.xlu1 %v635_v13, %s1869_s21  ;;  %1753 = vmatprep.subr.bf16.mxu1 %v1870_v63  ;;  %v1843_v13 = vld [vmem:[%s2472_s1 + $0x40] sm:$0xff]  }
  0x47   : > { %674 = vrot.lane.b32.xlu0 %v539_v17, %s1869_s21 }
  0x48   : > { %1140 = vmatpush1.bf16.msra.mxu0 %v1837_v3 }
  0x49   : > { %1141 = vmatprep.subr.bf16.mxu0 %v1870_v63  ;;  %1762 = vmatpush1.bf16.msra.mxu1 %v1837_v3 }
  0x4a   : > { %781 = vrot.lane.b32.xlu1 %v744_v24, %s1868_s20  ;;  %1754 = vmatprep.subr.bf16.mxu1 %v1870_v63 }
  0x4b   : > { %765 = vrot.lane.b32.xlu0 %v720_v29, %s1868_s20 }
  0x4c   : > { %1142 = vmatpush1.bf16.msra.mxu0 %v1838_v4 }
  0x4d   : > { %1143 = vmatprep.subr.bf16.mxu0 %v1870_v63  ;;  %1763 = vmatpush1.bf16.msra.mxu1 %v1838_v4 }
  0x4e   : > { %692 = vrot.lane.b32.xlu1 %v647_v38, %s1869_s21  ;;  %1755 = vmatprep.subr.bf16.mxu1 %v1870_v63 }
  0x4f   : > { %676 = vrot.lane.b32.xlu0 %v551_v45, %s1869_s21 }
  0x50   : > { %1144 = vmatpush1.bf16.msra.mxu0 %v1839_v5 }
  0x51   : > { %1145 = vmatprep.subr.bf16.mxu0 %v1870_v63  ;;  %1764 = vmatpush1.bf16.msra.mxu1 %v1839_v5 }
  0x52   : > { %783 = vrot.lane.b32.xlu1 %v747_v46, %s1868_s20  ;;  %1756 = vmatprep.subr.bf16.mxu1 %v1870_v63 }
  0x53   : > { %767 = vrot.lane.b32.xlu0 %v723_v55, %s1868_s20 }
  0x54   : > { %1146 = vmatpush1.bf16.msra.mxu0 %v1840_v7 }
  0x55   : > { %1147 = vmatprep.subr.bf16.mxu0 %v1870_v63  ;;  %1765 = vmatpush1.bf16.msra.mxu1 %v1840_v7 }
  0x56   : > { %660 = vrot.lane.b32.xlu1 %v455_v60, %s1869_s21  ;;  %1757 = vmatprep.subr.bf16.mxu1 %v1870_v63 }
  0x57   : > { %694 = vrot.lane.b32.xlu0 %v659_v52, %s1869_s21  ;;  %s1718_s21 = sshll.u32 %s2480_s12, 7 }
  0x58   : > { %1148 = vmatpush1.bf16.msra.mxu0 %v1841_v9  ;;  %s2366_s24 = scalar_lea.vmem %s2474_s3, %s1718_s21 }
  0x59   : > { %1149 = vmatprep.subr.bf16.mxu0 %v1870_v63  ;;  %1766 = vmatpush1.bf16.msra.mxu1 %v1841_v9 }
  0x5a   : > { %751 = vrot.lane.b32.xlu1 %v699_v22, %s1868_s20  ;;  %1758 = vmatprep.subr.bf16.mxu1 %v1870_v63 }
  0x5b   : > { %785 = vrot.lane.b32.xlu0 %v750_v12, %s1868_s20 }
  0x5c   : > { %1150 = vmatpush1.bf16.msra.mxu0 %v1842_v11 }
  0x5d   : > { %1151 = vmatprep.subr.bf16.mxu0 %v1870_v63  ;;  %1767 = vmatpush1.bf16.msra.mxu1 %v1842_v11 }
  0x5e   : > { %1759 = vmatprep.subr.bf16.mxu1 %v1870_v63 }
  0x60   : > { %1152 = vmatpush1.bf16.msra.mxu0 %v1843_v13 }
  0x61   : > { %1768 = vmatpush1.bf16.msra.mxu1 %v1843_v13 }
  0x88   : > { %v770_v12 = vpop.permute.xlu1 %769 }
  0x89   : > { %v754_v14 = vpop.permute.xlu0 %753 }
  0x8c   : > { %v772_v16 = vpop.permute.xlu1 %771 }
  0x8d   : > { %v756_v17 = vpop.permute.xlu0 %755 }
  0x90   : > { %v665_v19 = vpop.permute.xlu1 %664 }
  0x91   : > { %v663_v20 = vpop.permute.xlu0 %662  ;;  %v793_v24 = vsel %vm787_vm2, %v1933_v8, %v665_v19 }
  0x92   : > { %v791_v21 = vsel %vm787_vm2, %v1924_v2, %v663_v20  ;;  %v2164_v29 = vsel %vm824_vm3, %v793_v24, %v756_v17 }
  0x93   : > { %v2155_v22 = vsel %vm824_vm3, %v791_v21, %v754_v14 }
  0x94   : > { %877 = vrot.lane.b32.xlu0 %v2155_v22, %s1871_s17  ;;  %v681_v26 = vpop.permute.xlu1 %680 }
  0x95   : > { %v679_v27 = vpop.permute.xlu0 %678  ;;  %v809_v30 = vsel %vm787_vm2, %v1929_v6, %v681_v26 }
  0x96   : > { %v807_v28 = vsel %vm787_vm2, %v1920_v0, %v679_v27  ;;  %v2178_v32 = vsel %vm824_vm3, %v809_v30, %v772_v16 }
  0x97   : > { %v2167_v2 = vsel %vm824_vm3, %v807_v28, %v770_v12 }
  0x98   : > { %910 = vrot.lane.b32.xlu0 %v2164_v29, %s1872_s18  ;;  %893 = vrot.lane.b32.xlu1 %v2167_v2, %s1871_s17  ;;  %v683_v8 = vpop.permute.xlu1 %682 }
  0x99   : > { %v667_v31 = vpop.permute.xlu0 %666  ;;  %v811_v36 = vsel %vm787_vm2, %v1964_v47, %v683_v8 }
  0x9a   : > { %v795_v0 = vsel %vm787_vm2, %v1949_v25, %v667_v31 }
  0x9c   : > { %879 = vrot.lane.b32.xlu0 %v2164_v29, %s1871_s17  ;;  %926 = vrot.lane.b32.xlu1 %v2178_v32, %s1872_s18  ;;  %v774_v6 = vpop.permute.xlu1 %773 }
  0x9d   : > { %v758_v33 = vpop.permute.xlu0 %757  ;;  %v2196_v39 = vsel %vm824_vm3, %v811_v36, %v774_v6 }
  0x9e   : > { %v2185_v34 = vsel %vm824_vm3, %v795_v0, %v758_v33 }
  0xa0   : > { %912 = vrot.lane.b32.xlu0 %v2185_v34, %s1872_s18  ;;  %895 = vrot.lane.b32.xlu1 %v2178_v32, %s1871_s17  ;;  %v685_v25 = vpop.permute.xlu1 %684 }
  0xa1   : > { %v669_v37 = vpop.permute.xlu0 %668  ;;  %v813_v45 = vsel %vm787_vm2, %v1977_v62, %v685_v25 }
  0xa2   : > { %v797_v38 = vsel %vm787_vm2, %v1974_v57, %v669_v37 }
  0xa4   : > { %881 = vrot.lane.b32.xlu0 %v2185_v34, %s1871_s17  ;;  %928 = vrot.lane.b32.xlu1 %v2196_v39, %s1872_s18  ;;  %v776_v47 = vpop.permute.xlu1 %775 }
  0xa5   : > { %v760_v41 = vpop.permute.xlu0 %759  ;;  %v2214_v53 = vsel %vm824_vm3, %v813_v45, %v776_v47 }
  0xa6   : > { %v2203_v42 = vsel %vm824_vm3, %v797_v38, %v760_v41 }
  0xa8   : > { %914 = vrot.lane.b32.xlu0 %v2203_v42, %s1872_s18  ;;  %897 = vrot.lane.b32.xlu1 %v2196_v39, %s1871_s17  ;;  %v687_v57 = vpop.permute.xlu1 %686 }
  0xa9   : > { %v671_v48 = vpop.permute.xlu0 %670  ;;  %v815_v54 = vsel %vm787_vm2, %v1996_v23, %v687_v57 }
  0xaa   : > { %v799_v51 = vsel %vm787_vm2, %v1991_v18, %v671_v48 }
  0xac   : > { %883 = vrot.lane.b32.xlu0 %v2203_v42, %s1871_s17  ;;  %930 = vrot.lane.b32.xlu1 %v2214_v53, %s1872_s18  ;;  %v778_v62 = vpop.permute.xlu1 %777 }
  0xad   : > { %v762_v46 = vpop.permute.xlu0 %761  ;;  %v2232_v58 = vsel %vm824_vm3, %v815_v54, %v778_v62 }
  0xae   : > { %v2221_v50 = vsel %vm824_vm3, %v799_v51, %v762_v46 }
  0xb0   : > { %916 = vrot.lane.b32.xlu0 %v2221_v50, %s1872_s18  ;;  %899 = vrot.lane.b32.xlu1 %v2214_v53, %s1871_s17  ;;  %v689_v18 = vpop.permute.xlu1 %688 }
  0xb1   : > { %v673_v55 = vpop.permute.xlu0 %672  ;;  %v817_v61 = vsel %vm787_vm2, %v2012_v43, %v689_v18 }
  0xb2   : > { %v801_v56 = vsel %vm787_vm2, %v2017_v49, %v673_v55 }
  0xb4   : > { %885 = vrot.lane.b32.xlu0 %v2221_v50, %s1871_s17  ;;  %932 = vrot.lane.b32.xlu1 %v2232_v58, %s1872_s18  ;;  %v780_v23 = vpop.permute.xlu1 %779 }
  0xb5   : > { %v764_v60 = vpop.permute.xlu0 %763  ;;  %v2250_v3 = vsel %vm824_vm3, %v817_v61, %v780_v23 }
  0xb6   : > { %v2239_v52 = vsel %vm824_vm3, %v801_v56, %v764_v60 }
  0xb8   : > { %918 = vrot.lane.b32.xlu0 %v2239_v52, %s1872_s18  ;;  %901 = vrot.lane.b32.xlu1 %v2232_v58, %s1871_s17  ;;  %v691_v49 = vpop.permute.xlu1 %690 }
  0xb9   : > { %v675_v63 = vpop.permute.xlu0 %674  ;;  %v819_v7 = vsel %vm787_vm2, %v2037_v10, %v691_v49 }
  0xba   : > { %v803_v1 = vsel %vm787_vm2, %v2042_v15, %v675_v63 }
  0xbc   : > { %887 = vrot.lane.b32.xlu0 %v2239_v52, %s1871_s17  ;;  %934 = vrot.lane.b32.xlu1 %v2250_v3, %s1872_s18  ;;  %v782_v43 = vpop.permute.xlu1 %781 }
  0xbd   : > { %v766_v4 = vpop.permute.xlu0 %765  ;;  %v2268_v12 = vsel %vm824_vm3, %v819_v7, %v782_v43 }
  0xbe   : > { %v2257_v5 = vsel %vm824_vm3, %v803_v1, %v766_v4 }
  0xc0   : > { %920 = vrot.lane.b32.xlu0 %v2257_v5, %s1872_s18  ;;  %903 = vrot.lane.b32.xlu1 %v2250_v3, %s1871_s17  ;;  %v693_v9 = vpop.permute.xlu1 %692 }
  0xc1   : > { %v677_v15 = vpop.permute.xlu0 %676  ;;  %v821_v14 = vsel %vm787_vm2, %v2061_v35, %v693_v9 }
  0xc2   : > { %v805_v11 = vsel %vm787_vm2, %v2067_v40, %v677_v15 }
  0xc4   : > { %889 = vrot.lane.b32.xlu0 %v2257_v5, %s1871_s17  ;;  %936 = vrot.lane.b32.xlu1 %v2268_v12, %s1872_s18  ;;  %v784_v16 = vpop.permute.xlu1 %783 }
  0xc5   : > { %v768_v10 = vpop.permute.xlu0 %767  ;;  %v858_v17 = vsel %vm824_vm3, %v821_v14, %v784_v16 }
  0xc6   : > { %v842_v13 = vsel %vm824_vm3, %v805_v11, %v768_v10 }
  0xc8   : > { %922 = vrot.lane.b32.xlu0 %v842_v13, %s1872_s18  ;;  %905 = vrot.lane.b32.xlu1 %v2268_v12, %s1871_s17  ;;  %v661_v21 = vpop.permute.xlu1 %660 }
  0xc9   : > { %v695_v40 = vpop.permute.xlu0 %694  ;;  %v789_v24 = vsel %vm787_vm2, %v2085_v59, %v661_v21 }
  0xca   : > { %v823_v19 = vsel %vm787_vm2, %v2071_v44, %v695_v40 }
  0xcc   : > { %891 = vrot.lane.b32.xlu0 %v842_v13, %s1871_s17  ;;  %938 = vrot.lane.b32.xlu1 %v858_v17, %s1872_s18  ;;  %v752_v26 = vpop.permute.xlu1 %751 }
  0xcd   : > { %v786_v20 = vpop.permute.xlu0 %785  ;;  %v826_v44 = vsel %vm824_vm3, %v789_v24, %v752_v26 }
  0xce   : > { %v860_v35 = vsel %vm824_vm3, %v823_v19, %v786_v20 }
  0xd0   : > { %924 = vrot.lane.b32.xlu0 %v2167_v2, %s1872_s18  ;;  %907 = vrot.lane.b32.xlu1 %v858_v17, %s1871_s17 }
  0xd4   : > { %940 = vrot.lane.b32.xlu1 %v860_v35, %s1872_s18 }
 0x106   : > { %v878_v27 = vpop.permute.xlu0 %877 }
 0x107   : > { %v944_v28 = vsel %vm942_vm4, %v826_v44, %v878_v27 }
 0x10a   : > { %v911_v30 = vpop.permute.xlu0 %910  ;;  %v894_v8 = vpop.permute.xlu1 %893 }
 0x10b   : > { %1668 = vmatprep.mubr.msk.bf16.mxu0 %vm787_vm2, %v911_v30  ;;  %v977_v31 = vsel %vm975_vm5, %v944_v28, %v911_v30  ;;  %v960_v0 = vsel %vm942_vm4, %v842_v13, %v894_v8 }
 0x10c   : > { %1168 = vmatmul.mubr.bf16.vlgmr.msra.gmra.mrb[0].mxu0 %v977_v31 }
 0x10e   : > { %v880_v6 = vpop.permute.xlu0 %879  ;;  %v927_v33 = vpop.permute.xlu1 %926 }
 0x10f   : > { %1676 = vmatprep.mubr.msk.bf16.mxu1 %vm787_vm2, %v927_v33  ;;  %v1001_v59 = vsel %vm975_vm5, %v960_v0, %v927_v33  ;;  %v946_v36 = vsel %vm942_vm4, %v2155_v22, %v880_v6 }
 0x110   : > { %1232 = vmatmul.mubr.bf16.vlgmr.msra.gmra.mrb[0].mxu1 %v1001_v59 }
 0x112   : > { %v913_v25 = vpop.permute.xlu0 %912  ;;  %v896_v37 = vpop.permute.xlu1 %895 }
 0x113   : > { %1669 = vmatprep.mubr.msk.bf16.mxu0 %vm787_vm2, %v913_v25  ;;  %v980_v38 = vsel %vm975_vm5, %v946_v36, %v913_v25  ;;  %v962_v47 = vsel %vm942_vm4, %v2167_v2, %v896_v37 }
 0x114   : > { %1176 = vmatmul.mubr.bf16.gmra.mrb[4].mxu0 %v980_v38 }
 0x116   : > { %v882_v41 = vpop.permute.xlu0 %881  ;;  %v929_v45 = vpop.permute.xlu1 %928 }
 0x117   : > { %1677 = vmatprep.mubr.msk.bf16.mxu1 %vm787_vm2, %v929_v45  ;;  %v1004_v57 = vsel %vm975_vm5, %v962_v47, %v929_v45  ;;  %v948_v22 = vsel %vm942_vm4, %v2164_v29, %v882_v41 }
 0x118   : > { %1240 = vmatmul.mubr.bf16.gmra.mrb[4].mxu1 %v1004_v57 }
 0x11a   : > { %v915_v48 = vpop.permute.xlu0 %914  ;;  %v898_v51 = vpop.permute.xlu1 %897 }
 0x11b   : > { %1670 = vmatprep.mubr.msk.bf16.mxu0 %vm787_vm2, %v915_v48  ;;  %v983_v62 = vsel %vm975_vm5, %v948_v22, %v915_v48  ;;  %v964_v2 = vsel %vm942_vm4, %v2178_v32, %v898_v51 }
 0x11c   : > { %1184 = vmatmul.mubr.bf16.gmra.mrb[8].mxu0 %v983_v62 }
 0x11e   : > { %v884_v46 = vpop.permute.xlu0 %883  ;;  %v931_v54 = vpop.permute.xlu1 %930 }
 0x11f   : > { %1678 = vmatprep.mubr.msk.bf16.mxu1 %vm787_vm2, %v931_v54  ;;  %v1007_v18 = vsel %vm975_vm5, %v964_v2, %v931_v54  ;;  %v950_v29 = vsel %vm942_vm4, %v2185_v34, %v884_v46 }
 0x120   : > { %1248 = vmatmul.mubr.bf16.gmra.mrb[8].mxu1 %v1007_v18 }
 0x122   : > { %v917_v55 = vpop.permute.xlu0 %916  ;;  %v900_v56 = vpop.permute.xlu1 %899 }
 0x123   : > { %1671 = vmatprep.mubr.msk.bf16.mxu0 %vm787_vm2, %v917_v55  ;;  %v986_v23 = vsel %vm975_vm5, %v950_v29, %v917_v55  ;;  %v966_v32 = vsel %vm942_vm4, %v2196_v39, %v900_v56 }
 0x124   : > { %1192 = vmatmul.mubr.bf16.gmra.mrb[12].mxu0 %v986_v23 }
 0x126   : > { %v886_v60 = vpop.permute.xlu0 %885  ;;  %v933_v61 = vpop.permute.xlu1 %932 }
 0x127   : > { %1679 = vmatprep.mubr.msk.bf16.mxu1 %vm787_vm2, %v933_v61  ;;  %v1010_v49 = vsel %vm975_vm5, %v966_v32, %v933_v61  ;;  %v952_v34 = vsel %vm942_vm4, %v2203_v42, %v886_v60 }
 0x128   : > { %1256 = vmatmul.mubr.bf16.gmra.mrb[12].mxu1 %v1010_v49 }
 0x12a   : > { %v919_v63 = vpop.permute.xlu0 %918  ;;  %v902_v1 = vpop.permute.xlu1 %901 }
 0x12b   : > { %1672 = vmatprep.mubr.msk.bf16.mxu0 %vm787_vm2, %v919_v63  ;;  %v989_v43 = vsel %vm975_vm5, %v952_v34, %v919_v63  ;;  %v968_v39 = vsel %vm942_vm4, %v2214_v53, %v902_v1 }
 0x12c   : > { %1200 = vmatmul.mubr.bf16.gmra.mrb[16].mxu0 %v989_v43 }
 0x12e   : > { %v888_v4 = vpop.permute.xlu0 %887  ;;  %v935_v7 = vpop.permute.xlu1 %934 }
 0x12f   : > { %1680 = vmatprep.mubr.msk.bf16.mxu1 %vm787_vm2, %v935_v7  ;;  %v1013_v15 = vsel %vm975_vm5, %v968_v39, %v935_v7  ;;  %v954_v42 = vsel %vm942_vm4, %v2221_v50, %v888_v4 }
 0x130   : > { %1264 = vmatmul.mubr.bf16.gmra.mrb[16].mxu1 %v1013_v15 }
 0x132   : > { %v921_v9 = vpop.permute.xlu0 %920  ;;  %v904_v11 = vpop.permute.xlu1 %903 }
 0x133   : > { %1673 = vmatprep.mubr.msk.bf16.mxu0 %vm787_vm2, %v921_v9  ;;  %v992_v10 = vsel %vm975_vm5, %v954_v42, %v921_v9  ;;  %v970_v53 = vsel %vm942_vm4, %v2232_v58, %v904_v11 }
 0x134   : > { %1208 = vmatmul.mubr.bf16.gmra.mrb[20].mxu0 %v992_v10 }
 0x136   : > { %v890_v13 = vpop.permute.xlu0 %889  ;;  %v937_v14 = vpop.permute.xlu1 %936 }
 0x137   : > { %1681 = vmatprep.mubr.msk.bf16.mxu1 %vm787_vm2, %v937_v14  ;;  %v1016_v16 = vsel %vm975_vm5, %v970_v53, %v937_v14  ;;  %v956_v50 = vsel %vm942_vm4, %v2239_v52, %v890_v13 }
 0x138   : > { %1272 = vmatmul.mubr.bf16.gmra.mrb[20].mxu1 %v1016_v16 }
 0x13a   : > { %v923_v40 = vpop.permute.xlu0 %922  ;;  %v906_v17 = vpop.permute.xlu1 %905 }
 0x13b   : > { %1674 = vmatprep.mubr.msk.bf16.mxu0 %vm787_vm2, %v923_v40  ;;  %v995_v19 = vsel %vm975_vm5, %v956_v50, %v923_v40  ;;  %v972_v58 = vsel %vm942_vm4, %v2250_v3, %v906_v17 }
 0x13c   : > { %1216 = vmatmul.mubr.bf16.gmra.mrb[24].mxu0 %v995_v19 }
 0x13e   : > { %v892_v20 = vpop.permute.xlu0 %891  ;;  %v939_v35 = vpop.permute.xlu1 %938 }
 0x13f   : > { %1682 = vmatprep.mubr.msk.bf16.mxu1 %vm787_vm2, %v939_v35  ;;  %v1019_v21 = vsel %vm975_vm5, %v972_v58, %v939_v35  ;;  %v958_v52 = vsel %vm942_vm4, %v2257_v5, %v892_v20  ;;  %v2358_v5 = vld [vmem:[%s2473_s2] ss:$0 sm:$0xff] }
 0x140   : > { %1280 = vmatmul.mubr.bf16.gmra.mrb[24].mxu1 %v1019_v21 }
 0x142   : > { %v925_v24 = vpop.permute.xlu0 %924  ;;  %v908_v26 = vpop.permute.xlu1 %907 }
 0x143   : > { %1675 = vmatprep.mubr.msk.bf16.mxu0 %vm787_vm2, %v925_v24  ;;  %v998_v27 = vsel %vm975_vm5, %v958_v52, %v925_v24  ;;  %v974_v3 = vsel %vm942_vm4, %v2268_v12, %v908_v26 }
 0x144   : > { %1224 = vmatmul.mubr.bf16.gmra.mrb[28].mxu0 %v998_v27 }
 0x146   : > { %v941_v44 = vpop.permute.xlu1 %940 }
 0x147   : > { %1683 = vmatprep.mubr.msk.bf16.mxu1 %vm787_vm2, %v941_v44  ;;  %v1022_v28 = vsel %vm975_vm5, %v974_v3, %v941_v44 }
 0x148   : > { %1288 = vmatmul.mubr.bf16.gmra.mrb[28].mxu1 %v1022_v28 }
 0x1df   : > { %v1169_v30 = vpop.f32.mrb[0].mxu0 }
 0x1e0   : > { %v1170_v8 = vadd.f32 %v2358_v5, %v1169_v30  ;;  %v1171_v31 = vpop.f32.mrb[1].mxu0 }
 0x1e1   : > { %v1172_v0 = vpop.f32.mrb[2].mxu0 }
 0x1e2   : > { %v1296_v6 = vmax.f32 %v1170_v8, 0.0  ;;  %v1173_v12 = vadd.f32 %v2358_v5, %v1172_v0  ;;  %v1174_v33 = vpop.f32.mrb[3].mxu0 }
 0x1e3   : > { %v1233_v59 = vpop.f32.mrb[0].mxu1 }
 0x1e4   : > { %v1719_v36 = vpack.c.bf16 %v1296_v6, %v1296_v6  ;;  %v1297_v25 = vmax.f32 %v1173_v12, 0.0  ;;  %v1234_v37 = vadd.f32 %v2358_v5, %v1233_v59  ;;  %v1235_v38 = vpop.f32.mrb[1].mxu1 }
 0x1e5   : > { %v1236_v47 = vpop.f32.mrb[2].mxu1 }
 0x1e6   : > { %1457 = vst.msk [vmem:[%s2366_s24] sm:$0xf] %vm1456_vm6, %v1719_v36  ;;  %v1720_v41 = vpack.c.bf16 %v1297_v25, %v1297_v25  ;;  %v1312_v45 = vmax.f32 %v1234_v37, 0.0  ;;  %v1237_v57 = vadd.f32 %v2358_v5, %v1236_v47  ;;  %v1238_v22 = vpop.f32.mrb[3].mxu1 }
 0x1e7   : > { %v1177_v48 = vpop.f32.mrb[4].mxu0 }
 0x1e8   : > { %1458 = vst.msk [vmem:[%s2366_s24 + $0x4] sm:$0xf] %vm1456_vm6, %v1720_v41  ;;  %v1735_v51 = vpack.c.bf16 %v1312_v45, %v1312_v45  ;;  %v1313_v62 = vmax.f32 %v1237_v57, 0.0  ;;  %v1178_v2 = vadd.f32 %v2358_v5, %v1177_v48  ;;  %v1179_v46 = vpop.f32.mrb[5].mxu0 }
 0x1e9   : > { %v1180_v54 = vpop.f32.mrb[6].mxu0 }
 0x1ea   : > { %1473 = vst.msk [vmem:[%s2366_s24 + $0x40] sm:$0xf] %vm1456_vm6, %v1735_v51  ;;  %v1736_v18 = vpack.c.bf16 %v1313_v62, %v1313_v62  ;;  %v1298_v29 = vmax.f32 %v1178_v2, 0.0  ;;  %v1181_v55 = vadd.f32 %v2358_v5, %v1180_v54  ;;  %v1182_v56 = vpop.f32.mrb[7].mxu0 }
 0x1eb   : > { %v1241_v23 = vpop.f32.mrb[4].mxu1 }
 0x1ec   : > { %1474 = vst.msk [vmem:[%s2366_s24 + $0x44] sm:$0xf] %vm1456_vm6, %v1736_v18  ;;  %v1721_v32 = vpack.c.bf16 %v1298_v29, %v1298_v29  ;;  %v1299_v60 = vmax.f32 %v1181_v55, 0.0  ;;  %v1242_v61 = vadd.f32 %v2358_v5, %v1241_v23  ;;  %v1243_v49 = vpop.f32.mrb[5].mxu1 }
 0x1ed   : > { %v1244_v34 = vpop.f32.mrb[6].mxu1 }
 0x1ee   : > { %1459 = vst.msk [vmem:[%s2366_s24 + $0x8] sm:$0xf] %vm1456_vm6, %v1721_v32  ;;  %v1722_v63 = vpack.c.bf16 %v1299_v60, %v1299_v60  ;;  %v1314_v1 = vmax.f32 %v1242_v61, 0.0  ;;  %v1245_v43 = vadd.f32 %v2358_v5, %v1244_v34  ;;  %v1246_v39 = vpop.f32.mrb[7].mxu1 }
 0x1ef   : > { %v1185_v4 = vpop.f32.mrb[8].mxu0 }
 0x1f0   : > { %1460 = vst.msk [vmem:[%s2366_s24 + $0xc] sm:$0xf] %vm1456_vm6, %v1722_v63  ;;  %v1737_v7 = vpack.c.bf16 %v1314_v1, %v1314_v1  ;;  %v1315_v15 = vmax.f32 %v1245_v43, 0.0  ;;  %v1186_v42 = vadd.f32 %v2358_v5, %v1185_v4  ;;  %v1187_v9 = vpop.f32.mrb[9].mxu0 }
 0x1f1   : > { %v1188_v11 = vpop.f32.mrb[10].mxu0 }
 0x1f2   : > { %1475 = vst.msk [vmem:[%s2366_s24 + $0x48] sm:$0xf] %vm1456_vm6, %v1737_v7  ;;  %v1738_v10 = vpack.c.bf16 %v1315_v15, %v1315_v15  ;;  %v1300_v53 = vmax.f32 %v1186_v42, 0.0  ;;  %v1189_v13 = vadd.f32 %v2358_v5, %v1188_v11  ;;  %v1190_v14 = vpop.f32.mrb[11].mxu0 }
 0x1f3   : > { %v1249_v16 = vpop.f32.mrb[8].mxu1 }
 0x1f4   : > { %1476 = vst.msk [vmem:[%s2366_s24 + $0x4c] sm:$0xf] %vm1456_vm6, %v1738_v10  ;;  %v1723_v50 = vpack.c.bf16 %v1300_v53, %v1300_v53  ;;  %v1301_v40 = vmax.f32 %v1189_v13, 0.0  ;;  %v1250_v17 = vadd.f32 %v2358_v5, %v1249_v16  ;;  %v1251_v19 = vpop.f32.mrb[9].mxu1 }
 0x1f5   : > { %v1252_v58 = vpop.f32.mrb[10].mxu1 }
 0x1f6   : > { %1461 = vst.msk [vmem:[%s2366_s24 + $0x10] sm:$0xf] %vm1456_vm6, %v1723_v50  ;;  %v1724_v20 = vpack.c.bf16 %v1301_v40, %v1301_v40  ;;  %v1316_v35 = vmax.f32 %v1250_v17, 0.0  ;;  %v1253_v21 = vadd.f32 %v2358_v5, %v1252_v58  ;;  %v1254_v52 = vpop.f32.mrb[11].mxu1 }
 0x1f7   : > { %v1193_v24 = vpop.f32.mrb[12].mxu0 }
 0x1f8   : > { %1462 = vst.msk [vmem:[%s2366_s24 + $0x14] sm:$0xf] %vm1456_vm6, %v1724_v20  ;;  %v1739_v26 = vpack.c.bf16 %v1316_v35, %v1316_v35  ;;  %v1317_v27 = vmax.f32 %v1253_v21, 0.0  ;;  %v1194_v3 = vadd.f32 %v2358_v5, %v1193_v24  ;;  %v1195_v44 = vpop.f32.mrb[13].mxu0 }
 0x1f9   : > { %v1196_v28 = vpop.f32.mrb[14].mxu0 }
 0x1fa   : > { %1477 = vst.msk [vmem:[%s2366_s24 + $0x50] sm:$0xf] %vm1456_vm6, %v1739_v26  ;;  %v1740_v30 = vpack.c.bf16 %v1317_v27, %v1317_v27  ;;  %v1302_v8 = vmax.f32 %v1194_v3, 0.0  ;;  %v1197_v31 = vadd.f32 %v2358_v5, %v1196_v28  ;;  %v1198_v0 = vpop.f32.mrb[15].mxu0 }
 0x1fb   : > { %v1257_v6 = vpop.f32.mrb[12].mxu1 }
 0x1fc   : > { %1478 = vst.msk [vmem:[%s2366_s24 + $0x54] sm:$0xf] %vm1456_vm6, %v1740_v30  ;;  %v1725_v12 = vpack.c.bf16 %v1302_v8, %v1302_v8  ;;  %v1303_v33 = vmax.f32 %v1197_v31, 0.0  ;;  %v1258_v59 = vadd.f32 %v2358_v5, %v1257_v6  ;;  %v1259_v36 = vpop.f32.mrb[13].mxu1 }
 0x1fd   : > { %v1260_v25 = vpop.f32.mrb[14].mxu1 }
 0x1fe   : > { %1463 = vst.msk [vmem:[%s2366_s24 + $0x18] sm:$0xf] %vm1456_vm6, %v1725_v12  ;;  %v1726_v37 = vpack.c.bf16 %v1303_v33, %v1303_v33  ;;  %v1318_v38 = vmax.f32 %v1258_v59, 0.0  ;;  %v1261_v47 = vadd.f32 %v2358_v5, %v1260_v25  ;;  %v1262_v41 = vpop.f32.mrb[15].mxu1 }
 0x1ff   : > { %v1201_v45 = vpop.f32.mrb[16].mxu0 }
 0x200   : > { %1464 = vst.msk [vmem:[%s2366_s24 + $0x1c] sm:$0xf] %vm1456_vm6, %v1726_v37  ;;  %v1741_v57 = vpack.c.bf16 %v1318_v38, %v1318_v38  ;;  %v1319_v22 = vmax.f32 %v1261_v47, 0.0  ;;  %v1202_v48 = vadd.f32 %v2358_v5, %v1201_v45  ;;  %v1203_v51 = vpop.f32.mrb[17].mxu0 }
 0x201   : > { %v1204_v62 = vpop.f32.mrb[18].mxu0 }
 0x202   : > { %1479 = vst.msk [vmem:[%s2366_s24 + $0x58] sm:$0xf] %vm1456_vm6, %v1741_v57  ;;  %v1742_v2 = vpack.c.bf16 %v1319_v22, %v1319_v22  ;;  %v1304_v46 = vmax.f32 %v1202_v48, 0.0  ;;  %v1205_v54 = vadd.f32 %v2358_v5, %v1204_v62  ;;  %v1206_v18 = vpop.f32.mrb[19].mxu0 }
 0x203   : > { %v1265_v29 = vpop.f32.mrb[16].mxu1 }
 0x204   : > { %1480 = vst.msk [vmem:[%s2366_s24 + $0x5c] sm:$0xf] %vm1456_vm6, %v1742_v2  ;;  %v1727_v55 = vpack.c.bf16 %v1304_v46, %v1304_v46  ;;  %v1305_v56 = vmax.f32 %v1205_v54, 0.0  ;;  %v1266_v23 = vadd.f32 %v2358_v5, %v1265_v29  ;;  %v1267_v32 = vpop.f32.mrb[17].mxu1 }
 0x205   : > { %v1268_v60 = vpop.f32.mrb[18].mxu1 }
 0x206   : > { %1465 = vst.msk [vmem:[%s2366_s24 + $0x20] sm:$0xf] %vm1456_vm6, %v1727_v55  ;;  %v1728_v61 = vpack.c.bf16 %v1305_v56, %v1305_v56  ;;  %v1320_v49 = vmax.f32 %v1266_v23, 0.0  ;;  %v1269_v34 = vadd.f32 %v2358_v5, %v1268_v60  ;;  %v1270_v63 = vpop.f32.mrb[19].mxu1 }
 0x207   : > { %v1209_v1 = vpop.f32.mrb[20].mxu0 }
 0x208   : > { %1466 = vst.msk [vmem:[%s2366_s24 + $0x24] sm:$0xf] %vm1456_vm6, %v1728_v61  ;;  %v1743_v43 = vpack.c.bf16 %v1320_v49, %v1320_v49  ;;  %v1321_v39 = vmax.f32 %v1269_v34, 0.0  ;;  %v1210_v4 = vadd.f32 %v2358_v5, %v1209_v1  ;;  %v1211_v7 = vpop.f32.mrb[21].mxu0 }
 0x209   : > { %v1212_v15 = vpop.f32.mrb[22].mxu0 }
 0x20a   : > { %1481 = vst.msk [vmem:[%s2366_s24 + $0x60] sm:$0xf] %vm1456_vm6, %v1743_v43  ;;  %v1744_v42 = vpack.c.bf16 %v1321_v39, %v1321_v39  ;;  %v1306_v9 = vmax.f32 %v1210_v4, 0.0  ;;  %v1213_v11 = vadd.f32 %v2358_v5, %v1212_v15  ;;  %v1214_v10 = vpop.f32.mrb[23].mxu0 }
 0x20b   : > { %v1273_v53 = vpop.f32.mrb[20].mxu1 }
 0x20c   : > { %1482 = vst.msk [vmem:[%s2366_s24 + $0x64] sm:$0xf] %vm1456_vm6, %v1744_v42  ;;  %v1729_v13 = vpack.c.bf16 %v1306_v9, %v1306_v9  ;;  %v1307_v14 = vmax.f32 %v1213_v11, 0.0  ;;  %v1274_v16 = vadd.f32 %v2358_v5, %v1273_v53  ;;  %v1275_v50 = vpop.f32.mrb[21].mxu1 }
 0x20d   : > { %v1276_v40 = vpop.f32.mrb[22].mxu1 }
 0x20e   : > { %1467 = vst.msk [vmem:[%s2366_s24 + $0x28] sm:$0xf] %vm1456_vm6, %v1729_v13  ;;  %v1730_v17 = vpack.c.bf16 %v1307_v14, %v1307_v14  ;;  %v1322_v19 = vmax.f32 %v1274_v16, 0.0  ;;  %v1277_v58 = vadd.f32 %v2358_v5, %v1276_v40  ;;  %v1278_v20 = vpop.f32.mrb[23].mxu1 }
 0x20f   : > { %v1217_v35 = vpop.f32.mrb[24].mxu0 }
 0x210   : > { %1468 = vst.msk [vmem:[%s2366_s24 + $0x2c] sm:$0xf] %vm1456_vm6, %v1730_v17  ;;  %v1745_v21 = vpack.c.bf16 %v1322_v19, %v1322_v19  ;;  %v1323_v52 = vmax.f32 %v1277_v58, 0.0  ;;  %v1218_v24 = vadd.f32 %v2358_v5, %v1217_v35  ;;  %v1219_v26 = vpop.f32.mrb[25].mxu0 }
 0x211   : > { %v1220_v27 = vpop.f32.mrb[26].mxu0 }
 0x212   : > { %1483 = vst.msk [vmem:[%s2366_s24 + $0x68] sm:$0xf] %vm1456_vm6, %v1745_v21  ;;  %v1746_v3 = vpack.c.bf16 %v1323_v52, %v1323_v52  ;;  %v1308_v44 = vmax.f32 %v1218_v24, 0.0  ;;  %v1221_v28 = vadd.f32 %v2358_v5, %v1220_v27  ;;  %v1222_v30 = vpop.f32.mrb[27].mxu0 }
 0x213   : > { %v1281_v8 = vpop.f32.mrb[24].mxu1 }
 0x214   : > { %1484 = vst.msk [vmem:[%s2366_s24 + $0x6c] sm:$0xf] %vm1456_vm6, %v1746_v3  ;;  %v1731_v31 = vpack.c.bf16 %v1308_v44, %v1308_v44  ;;  %v1309_v0 = vmax.f32 %v1221_v28, 0.0  ;;  %v1282_v6 = vadd.f32 %v2358_v5, %v1281_v8  ;;  %v1283_v12 = vpop.f32.mrb[25].mxu1 }
 0x215   : > { %v1284_v33 = vpop.f32.mrb[26].mxu1 }
 0x216   : > { %1469 = vst.msk [vmem:[%s2366_s24 + $0x30] sm:$0xf] %vm1456_vm6, %v1731_v31  ;;  %v1732_v59 = vpack.c.bf16 %v1309_v0, %v1309_v0  ;;  %v1324_v36 = vmax.f32 %v1282_v6, 0.0  ;;  %v1285_v25 = vadd.f32 %v2358_v5, %v1284_v33  ;;  %v1286_v37 = vpop.f32.mrb[27].mxu1 }
 0x217   : > { %v1225_v38 = vpop.f32.mrb[28].mxu0 }
 0x218   : > { %1470 = vst.msk [vmem:[%s2366_s24 + $0x34] sm:$0xf] %vm1456_vm6, %v1732_v59  ;;  %v1747_v47 = vpack.c.bf16 %v1324_v36, %v1324_v36  ;;  %v1325_v41 = vmax.f32 %v1285_v25, 0.0  ;;  %v1226_v45 = vadd.f32 %v2358_v5, %v1225_v38  ;;  %v1227_v57 = vpop.f32.mrb[29].mxu0 }
 0x219   : > { %v1228_v22 = vpop.f32.mrb[30].mxu0 }
 0x21a   : > { %1485 = vst.msk [vmem:[%s2366_s24 + $0x70] sm:$0xf] %vm1456_vm6, %v1747_v47  ;;  %v1748_v48 = vpack.c.bf16 %v1325_v41, %v1325_v41  ;;  %v1310_v51 = vmax.f32 %v1226_v45, 0.0  ;;  %v1229_v62 = vadd.f32 %v2358_v5, %v1228_v22  ;;  %v1230_v2 = vpop.f32.mrb[31].mxu0 }
 0x21b   : > { %v1289_v46 = vpop.f32.mrb[28].mxu1 }
 0x21c   : > { %1486 = vst.msk [vmem:[%s2366_s24 + $0x74] sm:$0xf] %vm1456_vm6, %v1748_v48  ;;  %v1733_v54 = vpack.c.bf16 %v1310_v51, %v1310_v51  ;;  %v1311_v18 = vmax.f32 %v1229_v62, 0.0  ;;  %v1290_v29 = vadd.f32 %v2358_v5, %v1289_v46  ;;  %v1291_v55 = vpop.f32.mrb[29].mxu1 }
 0x21d   : > { %v1292_v56 = vpop.f32.mrb[30].mxu1 }
 0x21e   : > { %1471 = vst.msk [vmem:[%s2366_s24 + $0x38] sm:$0xf] %vm1456_vm6, %v1733_v54  ;;  %v1734_v23 = vpack.c.bf16 %v1311_v18, %v1311_v18  ;;  %v1326_v32 = vmax.f32 %v1290_v29, 0.0  ;;  %v1293_v60 = vadd.f32 %v2358_v5, %v1292_v56  ;;  %v1294_v61 = vpop.f32.mrb[31].mxu1 }
 0x220   : > { %1472 = vst.msk [vmem:[%s2366_s24 + $0x3c] sm:$0xf] %vm1456_vm6, %v1734_v23  ;;  %v1749_v49 = vpack.c.bf16 %v1326_v32, %v1326_v32  ;;  %v1327_v34 = vmax.f32 %v1293_v60, 0.0 }
 0x222   : > { %1487 = vst.msk [vmem:[%s2366_s24 + $0x78] sm:$0xf] %vm1456_vm6, %v1749_v49  ;;  %v1750_v63 = vpack.c.bf16 %v1327_v34, %v1327_v34 }
 0x224   : > { %1488 = vst.msk [vmem:[%s2366_s24 + $0x7c] sm:$0xf] %vm1456_vm6, %v1750_v63 }
 0x225 PF: > { %s13_s14 = sadd.s32 1, %s1866_s14   ;;  %s2475_s12 = smov %s1862_s13 }
 0x226   : > { %p10_p5 = scmp.ge.s32.totalorder %s13_s14, 4   ;;  %s2476_s13 = smov %s2478_s15 }
 0x228   :  { %12 = sbr.rel (!%p10_p5) target bundleno = 2 (0x2), region = 69 }

</bundles_post_ra>
